<compile_context>
chip_gen: v7x
topology: tpu7x:2x2x1
jax: 0.10.0
libtpu: 0.0.40
codegen_flags: <defaults>
</compile_context>

<pallas_src>
import jax
import jax.numpy as jnp
from jax.experimental import pallas as pl
from jax.experimental.pallas import tpu as pltpu

_LANES = 128      # vreg lane width
_SUBLANES = 8     # vreg sublane width (f32)


def _flash_attn_kernel(xq_ref, xkv_ref, wq_ref, wk_ref, wv_ref, bias_ref,
                       o_ref, q_scr, m_scr, l_scr, acc_scr):
    ki = pl.program_id(1)

    @pl.when(ki == 0)
    def _init():
        # Project this query tile once per KV sweep (1/sqrt(d_out) already
        # folded into wq_ref); keep it resident in bf16 for the score matmul.
        q_scr[...] = jnp.dot(
            xq_ref[...], wq_ref[...], preferred_element_type=jnp.float32
        ).astype(jnp.bfloat16)
        m_scr[...] = jnp.full(m_scr.shape, -jnp.inf, m_scr.dtype)
        l_scr[...] = jnp.zeros(l_scr.shape, l_scr.dtype)
        acc_scr[...] = jnp.zeros(acc_scr.shape, acc_scr.dtype)

    # Project this K/V tile (bf16 MXU operands, f32 accumulation).
    # TODO(synk): at large T with many query tiles, hoist the K/V projection
    # into its own gridded matmul so it is not recomputed per query tile.
    k = jnp.dot(xkv_ref[...], wk_ref[...],
                preferred_element_type=jnp.float32).astype(jnp.bfloat16)
    v = jnp.dot(xkv_ref[...], wv_ref[...],
                preferred_element_type=jnp.float32).astype(jnp.bfloat16)

    # Scores (tq, tk): contract over the zero-padded feature axis (padded
    # feature columns are zero, so they contribute nothing; no transpose
    # materialized).
    s = jax.lax.dot_general(
        q_scr[...], k,
        dimension_numbers=(((1,), (1,)), ((), ())),
        preferred_element_type=jnp.float32,
    )
    # Additive key-padding bias: 0 for valid keys, -1e30 for padded ones.
    s = s + bias_ref[...]

    # Online-softmax update (f32).
    m_prev = m_scr[...]
    m_new = jnp.maximum(m_prev, jnp.max(s, axis=-1, keepdims=True))
    alpha = jnp.exp(m_prev - m_new)
    p = jnp.exp(s - m_new)
    l_scr[...] = alpha * l_scr[...] + jnp.sum(p, axis=-1, keepdims=True)
    acc_scr[...] = alpha * acc_scr[...] + jnp.dot(
        p.astype(jnp.bfloat16), v, preferred_element_type=jnp.float32)
    m_scr[...] = m_new

    @pl.when(ki == pl.num_programs(1) - 1)
    def _finalize():
        o_ref[...] = (
            acc_scr[...] * pl.reciprocal(l_scr[...], approx=False)
        ).astype(o_ref.dtype)


def _round_up(n, m):
    return ((n + m - 1) // m) * m


def _pad_cols(w, target_cols):
    return jnp.pad(w, ((0, 0), (0, target_cols - w.shape[1])))


def make_self_attention_v1(w_query, w_key, w_value, *, tq=_LANES, tk=_LANES):
    """Prepares padded / scaled bf16 weights ONCE, returns a jitted apply fn."""
    d_in, d_out = w_query.shape
    d_pad = _round_up(d_out, _LANES)

    # Fold 1/sqrt(d_out) (original d_out, not the padded one) into W_q here so
    # the kernel never touches the scale.
    scale = 1.0 / (d_out ** 0.5)
    wq = _pad_cols(w_query * jnp.float32(scale), d_pad).astype(jnp.bfloat16)
    wk = _pad_cols(w_key, d_pad).astype(jnp.bfloat16)
    wv = _pad_cols(w_value, d_pad).astype(jnp.bfloat16)

    @jax.jit
    def apply(x):
        seq_len = x.shape[0]
        t_pad = _round_up(seq_len, max(tq, tk))
        assert t_pad % tq == 0 and t_pad % tk == 0

        x_p = jnp.pad(x, ((0, t_pad - seq_len), (0, 0))).astype(jnp.bfloat16)
        bias = jnp.where(jnp.arange(t_pad) < seq_len, 0.0, -1e30)
        bias = bias.astype(jnp.float32).reshape(1, t_pad)

        grid = (t_pad // tq, t_pad // tk)   # KV (reduction) axis last

        out_padded = pl.pallas_call(
            _flash_attn_kernel,
            out_shape=jax.ShapeDtypeStruct((t_pad, d_pad), jnp.float32),
            grid_spec=pltpu.PrefetchScalarGridSpec(
                num_scalar_prefetch=0,
                grid=grid,
                in_specs=[
                    pl.BlockSpec((tq, d_in), lambda qi, ki: (qi, 0)),    # x (Q tile)
                    pl.BlockSpec((tk, d_in), lambda qi, ki: (ki, 0)),    # x (KV tile)
                    pl.BlockSpec((d_in, d_pad), lambda qi, ki: (0, 0)),  # W_q * scale
                    pl.BlockSpec((d_in, d_pad), lambda qi, ki: (0, 0)),  # W_k
                    pl.BlockSpec((d_in, d_pad), lambda qi, ki: (0, 0)),  # W_v
                    pl.BlockSpec((1, tk), lambda qi, ki: (0, ki)),       # key bias
                ],
                out_specs=pl.BlockSpec((tq, d_pad), lambda qi, ki: (qi, 0)),
                scratch_shapes=[
                    pltpu.VMEM((tq, d_pad), jnp.bfloat16),  # resident Q tile
                    pltpu.VMEM((tq, 1), jnp.float32),       # running max m
                    pltpu.VMEM((tq, 1), jnp.float32),       # running sum l
                    pltpu.VMEM((tq, d_pad), jnp.float32),   # output accumulator
                ],
            ),
            compiler_params=pltpu.CompilerParams(
                dimension_semantics=("parallel", "arbitrary"),
                # Safe on every generation (v7x physical VMEM is 64 MiB);
                # re-derive tile sizes against this budget at real T.
                vmem_limit_bytes=32 * 1024 * 1024,
            ),
        )(x_p, x_p, wq, wk, wv, bias)

        return out_padded[:seq_len, :d_out].astype(x.dtype)

    return apply


def self_attention_ref(x, w_query, w_key, w_value):
    keys = x @ w_key
    queries = x @ w_query
    values = x @ w_value
    attn_scores = queries @ keys.T
    attn_weights = jax.nn.softmax(attn_scores / keys.shape[-1] ** 0.5, axis=-1)
    return attn_weights @ values


if __name__ == "__main__":
    # Inputs exactly as in the PyTorch script: (6, 3)
    x = jnp.array(
        [[0.43, 0.15, 0.89],
         [0.55, 0.87, 0.66],
         [0.57, 0.85, 0.64],
         [0.22, 0.58, 0.33],
         [0.77, 0.25, 0.10],
         [0.05, 0.80, 0.55]],
        dtype=jnp.float32,
    )

    d_in = x.shape[1]   # 3
    d_out = 2

    # Deterministic parameter init (matches torch.rand: uniform [0, 1))
    key = jax.random.PRNGKey(0)
    kq, kk, kv = jax.random.split(key, 3)
    w_query = jax.random.uniform(kq, (d_in, d_out), dtype=jnp.float32)
    w_key = jax.random.uniform(kk, (d_in, d_out), dtype=jnp.float32)
    w_value = jax.random.uniform(kv, (d_in, d_out), dtype=jnp.float32)

    # Weight prep (pad + scale fold + bf16 cast) hoisted out of the hot path.
    attn = make_self_attention_v1(w_query, w_key, w_value)

    out = attn(x)
    out = jax.block_until_ready(out)

    ref = self_attention_ref(x, w_query, w_key, w_value)
    assert out.shape == (x.shape[0], d_out)
    # Tolerance accounts for bf16 MXU operands (f32 accumulation).
    assert jnp.allclose(out, ref, atol=2e-2, rtol=2e-2), (out, ref)

    print("KERNEL_OK")
</pallas_src>

<mosaic_0001>
module attributes {stable_mosaic.version = 11 : i64} {
  func.func @_flash_attn_kernel(%arg0: i32, %arg1: i32, %arg2: memref<128x3xbf16, #tpu.memory_space<vmem>>, %arg3: memref<128x3xbf16, #tpu.memory_space<vmem>>, %arg4: memref<3x128xbf16, #tpu.memory_space<vmem>>, %arg5: memref<3x128xbf16, #tpu.memory_space<vmem>>, %arg6: memref<3x128xbf16, #tpu.memory_space<vmem>>, %arg7: memref<1x128xf32, #tpu.memory_space<vmem>>, %arg8: memref<128x128xf32, #tpu.memory_space<vmem>>, %arg9: memref<128x128xbf16, #tpu.memory_space<vmem>>, %arg10: memref<128x1xf32, #tpu.memory_space<vmem>>, %arg11: memref<128x1xf32, #tpu.memory_space<vmem>>, %arg12: memref<128x128xf32, #tpu.memory_space<vmem>>) attributes {dimension_semantics = [#tpu.dimension_semantics<parallel>, #tpu.dimension_semantics<arbitrary>], iteration_bounds = array<i64: 1, 1>, scalar_prefetch = 0 : i64, scratch_operands = 4 : i64, tpu.core_type = #tpu.core_type<tc>, window_params = [{transform_indices = @transform_0, window_bounds = array<i64: 128, 3>}, {transform_indices = @transform_1, window_bounds = array<i64: 128, 3>}, {pipeline_mode = #tpu.pipeline_mode<synchronous>, transform_indices = @transform_2, window_bounds = array<i64: 3, 128>}, {pipeline_mode = #tpu.pipeline_mode<synchronous>, transform_indices = @transform_3, window_bounds = array<i64: 3, 128>}, {pipeline_mode = #tpu.pipeline_mode<synchronous>, transform_indices = @transform_4, window_bounds = array<i64: 3, 128>}, {transform_indices = @transform_5, window_bounds = array<i64: 1, 128>}, {transform_indices = @transform_6, window_bounds = array<i64: 128, 128>}]} {
    %c0_i32 = arith.constant 0 : i32
    %0 = arith.cmpi eq, %arg1, %c0_i32 : i32
    %1 = arith.extui %0 : i1 to i32
    %c0_i32_0 = arith.constant 0 : i32
    %2 = arith.cmpi ne, %1, %c0_i32_0 : i32
    scf.if %2 {
      %c0_31 = arith.constant 0 : index
      %c0_32 = arith.constant 0 : index
      %42 = vector.load %arg2[%c0_31, %c0_32] : memref<128x3xbf16, #tpu.memory_space<vmem>>, vector<128x3xbf16>
      %c0_33 = arith.constant 0 : index
      %c0_34 = arith.constant 0 : index
      %43 = vector.load %arg4[%c0_33, %c0_34] : memref<3x128xbf16, #tpu.memory_space<vmem>>, vector<3x128xbf16>
      %cst_35 = arith.constant dense<0.000000e+00> : vector<128x128xf32>
      %44 = tpu.matmul %42, %43, %cst_35 {dimension_numbers = #tpu.dot_dimension_numbers<[1], [0], [0], [1], [0, 0, 1, 1], [], []>} : vector<128x3xbf16>, vector<3x128xbf16>, vector<128x128xf32> -> vector<128x128xf32>
      %45 = arith.truncf %44 : vector<128x128xf32> to vector<128x128xbf16>
      %c0_36 = arith.constant 0 : index
      %c0_37 = arith.constant 0 : index
      %46 = vector.load %arg9[%c0_36, %c0_37] : memref<128x128xbf16, #tpu.memory_space<vmem>>, vector<128x128xbf16>
      tpu.vector_store %arg9[%c0_36, %c0_37], %45 {strides = array<i32>} : memref<128x128xbf16, #tpu.memory_space<vmem>>, vector<128x128xbf16>,
      %cst_38 = arith.constant 0xFF800000 : f32
      %47 = vector.broadcast %cst_38 : f32 to vector<128x1xf32>
      %c0_39 = arith.constant 0 : index
      %c0_40 = arith.constant 0 : index
      %48 = vector.load %arg10[%c0_39, %c0_40] : memref<128x1xf32, #tpu.memory_space<vmem>>, vector<128x1xf32>
      tpu.vector_store %arg10[%c0_39, %c0_40], %47 {strides = array<i32>} : memref<128x1xf32, #tpu.memory_space<vmem>>, vector<128x1xf32>,
      %cst_41 = arith.constant 0.000000e+00 : f32
      %49 = vector.broadcast %cst_41 : f32 to vector<128x1xf32>
      %c0_42 = arith.constant 0 : index
      %c0_43 = arith.constant 0 : index
      %50 = vector.load %arg11[%c0_42, %c0_43] : memref<128x1xf32, #tpu.memory_space<vmem>>, vector<128x1xf32>
      tpu.vector_store %arg11[%c0_42, %c0_43], %49 {strides = array<i32>} : memref<128x1xf32, #tpu.memory_space<vmem>>, vector<128x1xf32>,
      %cst_44 = arith.constant 0.000000e+00 : f32
      %51 = vector.broadcast %cst_44 : f32 to vector<128x128xf32>
      %c0_45 = arith.constant 0 : index
      %c0_46 = arith.constant 0 : index
      %52 = vector.load %arg12[%c0_45, %c0_46] : memref<128x128xf32, #tpu.memory_space<vmem>>, vector<128x128xf32>
      tpu.vector_store %arg12[%c0_45, %c0_46], %51 {strides = array<i32>} : memref<128x128xf32, #tpu.memory_space<vmem>>, vector<128x128xf32>,
    } else {
    }
    %c0 = arith.constant 0 : index
    %c0_1 = arith.constant 0 : index
    %3 = vector.load %arg3[%c0, %c0_1] : memref<128x3xbf16, #tpu.memory_space<vmem>>, vector<128x3xbf16>
    %c0_2 = arith.constant 0 : index
    %c0_3 = arith.constant 0 : index
    %4 = vector.load %arg5[%c0_2, %c0_3] : memref<3x128xbf16, #tpu.memory_space<vmem>>, vector<3x128xbf16>
    %cst = arith.constant dense<0.000000e+00> : vector<128x128xf32>
    %5 = tpu.matmul %3, %4, %cst {dimension_numbers = #tpu.dot_dimension_numbers<[1], [0], [0], [1], [0, 0, 1, 1], [], []>} : vector<128x3xbf16>, vector<3x128xbf16>, vector<128x128xf32> -> vector<128x128xf32>
    %6 = arith.truncf %5 : vector<128x128xf32> to vector<128x128xbf16>
    %c0_4 = arith.constant 0 : index
    %c0_5 = arith.constant 0 : index
    %7 = vector.load %arg3[%c0_4, %c0_5] : memref<128x3xbf16, #tpu.memory_space<vmem>>, vector<128x3xbf16>
    %c0_6 = arith.constant 0 : index
    %c0_7 = arith.constant 0 : index
    %8 = vector.load %arg6[%c0_6, %c0_7] : memref<3x128xbf16, #tpu.memory_space<vmem>>, vector<3x128xbf16>
    %cst_8 = arith.constant dense<0.000000e+00> : vector<128x128xf32>
    %9 = tpu.matmul %7, %8, %cst_8 {dimension_numbers = #tpu.dot_dimension_numbers<[1], [0], [0], [1], [0, 0, 1, 1], [], []>} : vector<128x3xbf16>, vector<3x128xbf16>, vector<128x128xf32> -> vector<128x128xf32>
    %10 = arith.truncf %9 : vector<128x128xf32> to vector<128x128xbf16>
    %c0_9 = arith.constant 0 : index
    %c0_10 = arith.constant 0 : index
    %11 = vector.load %arg9[%c0_9, %c0_10] : memref<128x128xbf16, #tpu.memory_space<vmem>>, vector<128x128xbf16>
    %cst_11 = arith.constant dense<0.000000e+00> : vector<128x128xf32>
    %12 = tpu.matmul %11, %6, %cst_11 {dimension_numbers = #tpu.dot_dimension_numbers<[1], [1], [0], [0], [0, 0, 1, 0], [], []>} : vector<128x128xbf16>, vector<128x128xbf16>, vector<128x128xf32> -> vector<128x128xf32>
    %c0_12 = arith.constant 0 : index
    %c0_13 = arith.constant 0 : index
    %13 = vector.load %arg7[%c0_12, %c0_13] : memref<1x128xf32, #tpu.memory_space<vmem>>, vector<1x128xf32>
    %14 = vector.broadcast %13 : vector<1x128xf32> to vector<128x128xf32>
    %15 = arith.addf %12, %14 : vector<128x128xf32>
    %c0_14 = arith.constant 0 : index
    %c0_15 = arith.constant 0 : index
    %16 = vector.load %arg10[%c0_14, %c0_15] : memref<128x1xf32, #tpu.memory_space<vmem>>, vector<128x1xf32>
    %cst_16 = arith.constant dense<0xFF800000> : vector<128xf32>
    %17 = vector.multi_reduction <maximumf>, %15, %cst_16 [1] : vector<128x128xf32> to vector<128xf32>
    %18 = vector.shape_cast %17 : vector<128xf32> to vector<128x1xf32>
    %19 = arith.maximumf %16, %18 : vector<128x1xf32>
    %20 = arith.subf %16, %19 : vector<128x1xf32>
    %21 = math.exp %20 : vector<128x1xf32>
    %22 = vector.broadcast %19 : vector<128x1xf32> to vector<128x128xf32>
    %23 = arith.subf %15, %22 : vector<128x128xf32>
    %24 = math.exp %23 : vector<128x128xf32>
    %c0_17 = arith.constant 0 : index
    %c0_18 = arith.constant 0 : index
    %25 = vector.load %arg11[%c0_17, %c0_18] : memref<128x1xf32, #tpu.memory_space<vmem>>, vector<128x1xf32>
    %26 = arith.mulf %21, %25 : vector<128x1xf32>
    %cst_19 = arith.constant dense<0.000000e+00> : vector<128xf32>
    %27 = vector.multi_reduction <add>, %24, %cst_19 [1] : vector<128x128xf32> to vector<128xf32>
    %28 = vector.shape_cast %27 : vector<128xf32> to vector<128x1xf32>
    %29 = arith.addf %26, %28 : vector<128x1xf32>
    %c0_20 = arith.constant 0 : index
    %c0_21 = arith.constant 0 : index
    %30 = vector.load %arg11[%c0_20, %c0_21] : memref<128x1xf32, #tpu.memory_space<vmem>>, vector<128x1xf32>
    tpu.vector_store %arg11[%c0_20, %c0_21], %29 {strides = array<i32>} : memref<128x1xf32, #tpu.memory_space<vmem>>, vector<128x1xf32>,
    %c0_22 = arith.constant 0 : index
    %c0_23 = arith.constant 0 : index
    %31 = vector.load %arg12[%c0_22, %c0_23] : memref<128x128xf32, #tpu.memory_space<vmem>>, vector<128x128xf32>
    %32 = vector.broadcast %21 : vector<128x1xf32> to vector<128x128xf32>
    %33 = arith.mulf %32, %31 : vector<128x128xf32>
    %34 = arith.truncf %24 : vector<128x128xf32> to vector<128x128xbf16>
    %cst_24 = arith.constant dense<0.000000e+00> : vector<128x128xf32>
    %35 = tpu.matmul %34, %10, %cst_24 {dimension_numbers = #tpu.dot_dimension_numbers<[1], [0], [0], [1], [0, 0, 1, 1], [], []>} : vector<128x128xbf16>, vector<128x128xbf16>, vector<128x128xf32> -> vector<128x128xf32>
    %36 = arith.addf %33, %35 : vector<128x128xf32>
    %c0_25 = arith.constant 0 : index
    %c0_26 = arith.constant 0 : index
    %37 = vector.load %arg12[%c0_25, %c0_26] : memref<128x128xf32, #tpu.memory_space<vmem>>, vector<128x128xf32>
    tpu.vector_store %arg12[%c0_25, %c0_26], %36 {strides = array<i32>} : memref<128x128xf32, #tpu.memory_space<vmem>>, vector<128x128xf32>,
    %c0_27 = arith.constant 0 : index
    %c0_28 = arith.constant 0 : index
    %38 = vector.load %arg10[%c0_27, %c0_28] : memref<128x1xf32, #tpu.memory_space<vmem>>, vector<128x1xf32>
    tpu.vector_store %arg10[%c0_27, %c0_28], %19 {strides = array<i32>} : memref<128x1xf32, #tpu.memory_space<vmem>>, vector<128x1xf32>,
    %c0_i32_29 = arith.constant 0 : i32
    %39 = arith.cmpi eq, %arg1, %c0_i32_29 : i32
    %40 = arith.extui %39 : i1 to i32
    %c0_i32_30 = arith.constant 0 : i32
    %41 = arith.cmpi ne, %40, %c0_i32_30 : i32
    scf.if %41 {
      %c0_31 = arith.constant 0 : index
      %c0_32 = arith.constant 0 : index
      %42 = vector.load %arg12[%c0_31, %c0_32] : memref<128x128xf32, #tpu.memory_space<vmem>>, vector<128x128xf32>
      %c0_33 = arith.constant 0 : index
      %c0_34 = arith.constant 0 : index
      %43 = vector.load %arg11[%c0_33, %c0_34] : memref<128x1xf32, #tpu.memory_space<vmem>>, vector<128x1xf32>
      %44 = tpu.reciprocal %43 : vector<128x1xf32> -> vector<128x1xf32>
      %45 = vector.broadcast %44 : vector<128x1xf32> to vector<128x128xf32>
      %46 = arith.mulf %42, %45 : vector<128x128xf32>
      %c0_35 = arith.constant 0 : index
      %c0_36 = arith.constant 0 : index
      %47 = vector.load %arg8[%c0_35, %c0_36] : memref<128x128xf32, #tpu.memory_space<vmem>>, vector<128x128xf32>
      tpu.vector_store %arg8[%c0_35, %c0_36], %46 {strides = array<i32>} : memref<128x128xf32, #tpu.memory_space<vmem>>, vector<128x128xf32>,
    } else {
    }
    return
  }
  func.func @transform_0(%arg0: i32, %arg1: i32) -> (i32, i32) {
    %c0_i32 = arith.constant 0 : i32
    %c0_i32_0 = arith.constant 0 : i32
    return %arg0, %c0_i32 : i32, i32
  }
  func.func @transform_1(%arg0: i32, %arg1: i32) -> (i32, i32) {
    %c0_i32 = arith.constant 0 : i32
    %c0_i32_0 = arith.constant 0 : i32
    return %arg1, %c0_i32 : i32, i32
  }
  func.func @transform_2(%arg0: i32, %arg1: i32) -> (i32, i32) {
    %c0_i32 = arith.constant 0 : i32
    %c0_i32_0 = arith.constant 0 : i32
    %c0_i32_1 = arith.constant 0 : i32
    return %c0_i32, %c0_i32_0 : i32, i32
  }
  func.func @transform_3(%arg0: i32, %arg1: i32) -> (i32, i32) {
    %c0_i32 = arith.constant 0 : i32
    %c0_i32_0 = arith.constant 0 : i32
    %c0_i32_1 = arith.constant 0 : i32
    return %c0_i32, %c0_i32_0 : i32, i32
  }
  func.func @transform_4(%arg0: i32, %arg1: i32) -> (i32, i32) {
    %c0_i32 = arith.constant 0 : i32
    %c0_i32_0 = arith.constant 0 : i32
    %c0_i32_1 = arith.constant 0 : i32
    return %c0_i32, %c0_i32_0 : i32, i32
  }
  func.func @transform_5(%arg0: i32, %arg1: i32) -> (i32, i32) {
    %c0_i32 = arith.constant 0 : i32
    %c0_i32_0 = arith.constant 0 : i32
    return %c0_i32, %arg1 : i32, i32
  }
  func.func @transform_6(%arg0: i32, %arg1: i32) -> (i32, i32) {
    %c0_i32 = arith.constant 0 : i32
    %c0_i32_0 = arith.constant 0 : i32
    return %arg0, %c0_i32 : i32, i32
  }
}

</mosaic_0001>

<bundles_post_ra>
// kernel: apply.1
= control target key start
LH: loop header
LB: loop body
LE: loop exit
PB: predicated region body
PF: predicated region fallthrough
CT: control target
= control target key end

     0   :  { %vm110_vm0 = vcmask 1040384   ;;  %vm111_vm1 = vcmask 1041408   ;;  %vm85_vm2 = vcmask 23552   ;;  %v1799_v0 = vmov 65535   ;;  %s2422_s3 = inlined_call_operand.vmem [shape: bf16[3,128], index: 3, kind: input, shape index: {}]   ;;  %s2423_s1 = inlined_call_operand.vmem [shape: bf16[128,3], index: 1, kind: input, shape index: {}, may-alias: {0,1}]   ;;  %s2424_s2 = inlined_call_operand.vmem [shape: bf16[3,128], index: 2, kind: input, shape index: {}]   ;;  %s2425_s0 = inlined_call_operand.vmem [shape: bf16[128,3], index: 0, kind: input, shape index: {}, may-alias: {0,1}]   ;;  %s2426_s4 = inlined_call_operand.vmem [shape: bf16[3,128], index: 4, kind: input, shape index: {}]   ;;  %s2427_s5 = inlined_call_operand.vmem [shape: f32[1,128], index: 5, kind: input, shape index: {}]   ;;  %s2428_s6 = inlined_call_operand.vmem [shape: f32[128,128], index: 6, kind: output, shape index: {}]  }
   0x1   :  { %v112_v1 = vsel %vm110_vm0, 4294967295, %v1799_v0  ;;  %v295_v2 = vld [vmem:[%s2422_s3] sm:$0x3]  ;;  %v1851_v6 = vld [vmem:[%s2423_s1 + $0x8] sm:$0xff]   ;;  %v1856_v7 = vld [vmem:[%s2423_s1 + $0x10] sm:$0xff]   ;;  %vm230_vm3 = vcmask 7168  }
   0x2   :  { %v1687_v3 = vld [vmem:[%s2423_s1] sm:$0xff]   ;;  %v1844_v4 = vsel %vm111_vm1, %v112_v1, 0  ;;  %v1872_v11 = vld [vmem:[%s2423_s1 + $0x18] sm:$0xff]   ;;  %v1696_v12 = vld [vmem:[%s2425_s0 + $0x8] sm:$0xff]  }
   0x3   :  { %v366_v5 = vand.u32 %v295_v2, %v1844_v4  ;;  %1583 = vmatprep.mubr.msk.bf16.mxu1 %vm85_vm2, %v1687_v3  ;;  %v44_v8 = vld [vmem:[%s2424_s2] sm:$0x3]  ;;  %v1697_v13 = vld [vmem:[%s2425_s0 + $0x10] sm:$0xff]   ;;  %v1698_v15 = vld [vmem:[%s2425_s0 + $0x18] sm:$0xff]  }
   0x4   :  { %v115_v9 = vand.u32 %v1844_v4, %v44_v8  ;;  %v1695_v10 = vld [vmem:[%s2425_s0] sm:$0xff]   ;;  %v1898_v16 = vld [vmem:[%s2423_s1 + $0x28] sm:$0xff]   ;;  %v1906_v18 = vld [vmem:[%s2423_s1 + $0x30] sm:$0xff]  }
   0x5   :  { %1581 = vmatprep.subr.bf16.mxu1 %v366_v5  ;;  %1565 = vmatprep.mubr.msk.bf16.mxu0 %vm85_vm2, %v1695_v10  ;;  %v1884_v14 = vld [vmem:[%s2423_s1 + $0x20] sm:$0xff]   ;;  %v1700_v19 = vld [vmem:[%s2425_s0 + $0x28] sm:$0xff]   ;;  %v1920_v20 = vld [vmem:[%s2423_s1 + $0x38] sm:$0xff]  }
   0x6   :  { %1582 = vmatpush3.bf16.msra.mxu1 %v366_v5  ;;  %1563 = vmatprep.subr.bf16.mxu0 %v115_v9  ;;  %v1699_v17 = vld [vmem:[%s2425_s0 + $0x20] sm:$0xff]   ;;  %v1701_v21 = vld [vmem:[%s2425_s0 + $0x30] sm:$0xff]   ;;  %v1702_v22 = vld [vmem:[%s2425_s0 + $0x38] sm:$0xff]  }
   0x7   :  { %1564 = vmatpush3.bf16.msra.mxu0 %v115_v9  ;;  %v473_v10 = vld [vmem:[%s2426_s4] sm:$0x3] }
   0x9   :  { %1584 = vmatmul.mubr.msk.bf16.vlgmr.msra.gmra.mrb[0].mxu1 %vm85_vm2, %v1851_v6 }
   0xa   :  { %1587 = vmatprep.mubr.msk.bf16.mxu1 %vm85_vm2, %v1856_v7  ;;  %1566 = vmatmul.mubr.msk.bf16.vlgmr.msra.gmra.mrb[0].mxu0 %vm85_vm2, %v1696_v12  ;;  %v1800_v12 = vmov -inf  }
   0xb   :  { %1569 = vmatprep.mubr.msk.bf16.mxu0 %vm85_vm2, %v1697_v13  ;;  %233 = vst.msk [vmem:[#allocation3 + $0x10] sm:$0xff] %vm230_vm3, %v1800_v12  ;;  %231 = vst.msk [vmem:[#allocation3] sm:$0xff] %vm230_vm3, %v1800_v12  ;;  %v475_v13 = vand.u32 %v473_v10, %v1844_v4  ;;  %v1971_v4 = vld [vmem:[%s2427_s5] ss:$0 sm:$0xff] }
   0xc   :  { %232 = vst.msk [vmem:[#allocation3 + $0x8] sm:$0xff] %vm230_vm3, %v1800_v12  ;;  %234 = vst.msk [vmem:[#allocation3 + $0x18] sm:$0xff] %vm230_vm3, %v1800_v12 }
   0xd   :  { %235 = vst.msk [vmem:[#allocation3 + $0x20] sm:$0xff] %vm230_vm3, %v1800_v12  ;;  %236 = vst.msk [vmem:[#allocation3 + $0x28] sm:$0xff] %vm230_vm3, %v1800_v12  ;;  %1599 = vmatprep.subr.bf16.mxu0 %v475_v13 }
   0xe   :  { %237 = vst.msk [vmem:[#allocation3 + $0x30] sm:$0xff] %vm230_vm3, %v1800_v12  ;;  %238 = vst.msk [vmem:[#allocation3 + $0x38] sm:$0xff] %vm230_vm3, %v1800_v12  ;;  %1600 = vmatpush3.bf16.msra.mxu0 %v475_v13 }
   0xf   :  { %239 = vst.msk [vmem:[#allocation3 + $0x40] sm:$0xff] %vm230_vm3, %v1800_v12  ;;  %240 = vst.msk [vmem:[#allocation3 + $0x48] sm:$0xff] %vm230_vm3, %v1800_v12 }
  0x10   :  { %241 = vst.msk [vmem:[#allocation3 + $0x50] sm:$0xff] %vm230_vm3, %v1800_v12  ;;  %242 = vst.msk [vmem:[#allocation3 + $0x58] sm:$0xff] %vm230_vm3, %v1800_v12 }
  0x11   :  { %1588 = vmatmul.mubr.msk.bf16.gmra.mrb[4].mxu1 %vm85_vm2, %v1872_v11  ;;  %243 = vst.msk [vmem:[#allocation3 + $0x60] sm:$0xff] %vm230_vm3, %v1800_v12  ;;  %244 = vst.msk [vmem:[#allocation3 + $0x68] sm:$0xff] %vm230_vm3, %v1800_v12 }
  0x12   :  { %1591 = vmatprep.mubr.msk.bf16.mxu1 %vm85_vm2, %v1884_v14  ;;  %1570 = vmatmul.mubr.msk.bf16.gmra.mrb[4].mxu0 %vm85_vm2, %v1698_v15  ;;  %245 = vst.msk [vmem:[#allocation3 + $0x70] sm:$0xff] %vm230_vm3, %v1800_v12  ;;  %246 = vst.msk [vmem:[#allocation3 + $0x78] sm:$0xff] %vm230_vm3, %v1800_v12 }
  0x13   :  { %1573 = vmatprep.mubr.msk.bf16.mxu0 %vm85_vm2, %v1699_v17 }
  0x14   :  { %v2088_v12 = vld [vmem:[#allocation3 + $0x20] sm:$0xff] }
  0x19   :  { %1592 = vmatmul.mubr.msk.bf16.gmra.mrb[8].mxu1 %vm85_vm2, %v1898_v16 }
  0x1a   :  { %1595 = vmatprep.mubr.msk.bf16.mxu1 %vm85_vm2, %v1906_v18  ;;  %1574 = vmatmul.mubr.msk.bf16.gmra.mrb[8].mxu0 %vm85_vm2, %v1700_v19 }
  0x1b   :  { %1577 = vmatprep.mubr.msk.bf16.mxu0 %vm85_vm2, %v1701_v21 }
  0x21   :  { %1596 = vmatmul.mubr.msk.bf16.gmra.mrb[12].mxu1 %vm85_vm2, %v1920_v20 }
  0x22   :  { %1578 = vmatmul.mubr.msk.bf16.gmra.mrb[12].mxu0 %vm85_vm2, %v1702_v22 }
  0x23   :  { %1601 = vmatprep.mubr.msk.bf16.mxu0 %vm85_vm2, %v1687_v3 }
  0x2a   :  { %1602 = vmatmul.mubr.msk.bf16.vlgmr.msra.gmra.mrb[16].mxu0 %vm85_vm2, %v1851_v6 }
  0x2b   :  { %1605 = vmatprep.mubr.msk.bf16.mxu0 %vm85_vm2, %v1856_v7 }
  0x32   :  { %1606 = vmatmul.mubr.msk.bf16.gmra.mrb[20].mxu0 %vm85_vm2, %v1872_v11 }
  0x33   :  { %1609 = vmatprep.mubr.msk.bf16.mxu0 %vm85_vm2, %v1884_v14 }
  0x3a   :  { %1610 = vmatmul.mubr.msk.bf16.gmra.mrb[24].mxu0 %vm85_vm2, %v1898_v16 }
  0x3b   :  { %1613 = vmatprep.mubr.msk.bf16.mxu0 %vm85_vm2, %v1906_v18 }
  0x42   :  { %1614 = vmatmul.mubr.msk.bf16.gmra.mrb[28].mxu0 %vm85_vm2, %v1920_v20 }
  0xdc   :  { %v1585_v23 = vpop.f32.mrb[0].mxu1 }
  0xdd   :  { %v402_v24 = vpop.f32.mrb[1].mxu1  ;;  %v1567_v29 = vpop.f32.mrb[0].mxu0 }
  0xde   :  { %v1586_v25 = vpop.f32.mrb[2].mxu1  ;;  %v151_v31 = vpop.f32.mrb[1].mxu0 }
  0xdf   :  { %v466_v26 = vpack.c.bf16 %v1586_v25, %v1585_v23  ;;  %v405_v27 = vpop.f32.mrb[3].mxu1  ;;  %v1568_v33 = vpop.f32.mrb[2].mxu0 }
  0xe0   :  { %v465_v28 = vpack.c.bf16 %v405_v27, %v402_v24  ;;  %v215_v35 = vpack.c.bf16 %v1568_v33, %v1567_v29  ;;  %v154_v36 = vpop.f32.mrb[3].mxu0 }
  0xe1   :  { %v214_v39 = vpack.c.bf16 %v154_v36, %v151_v31  ;;  %v1801_v31 = vmov 0  }
  0xe2   :  { %1617 = vmatprep.subr.bf16.mxu1 %v465_v28  ;;  %1686 = vset.pattern.permute.xlu1 %v1801_v31 }
  0xe3   :  { %1618 = vmatpush3.bf16.xpose.msra.mxu1 %v465_v28  ;;  %1633 = vmatprep.mubr.bf16.mxu1 %v214_v39 }
  0xe4   :  { %1619 = vmatprep.subr.bf16.mxu1 %v466_v26  ;;  %v1589_v30 = vpop.f32.mrb[4].mxu1  ;;  %1685 = vset.pattern.permute.xlu0 %v1801_v31 }
  0xe5   :  { %v418_v32 = vpop.f32.mrb[5].mxu1  ;;  %v1571_v41 = vpop.f32.mrb[4].mxu0 }
  0xe6   :  { %v1590_v34 = vpop.f32.mrb[6].mxu1  ;;  %v167_v43 = vpop.f32.mrb[5].mxu0 }
  0xe7   :  { %v468_v37 = vpack.c.bf16 %v1590_v34, %v1589_v30  ;;  %v421_v38 = vpop.f32.mrb[7].mxu1  ;;  %v1572_v45 = vpop.f32.mrb[6].mxu0 }
  0xe8   :  { %v467_v40 = vpack.c.bf16 %v421_v38, %v418_v32  ;;  %v217_v47 = vpack.c.bf16 %v1572_v45, %v1571_v41  ;;  %v170_v48 = vpop.f32.mrb[7].mxu0 }
  0xe9   :  { %v216_v51 = vpack.c.bf16 %v170_v48, %v167_v43 }
  0xeb   :  { %1620 = vmatpush3.bf16.xpose.msra.mxu1 %v466_v26 }
  0xec   :  { %1621 = vmatprep.subr.bf16.mxu1 %v467_v40  ;;  %v1593_v42 = vpop.f32.mrb[8].mxu1 }
  0xed   :  { %v434_v44 = vpop.f32.mrb[9].mxu1  ;;  %v1575_v53 = vpop.f32.mrb[8].mxu0 }
  0xee   :  { %v1594_v46 = vpop.f32.mrb[10].mxu1  ;;  %v183_v55 = vpop.f32.mrb[9].mxu0 }
  0xef   :  { %v470_v49 = vpack.c.bf16 %v1594_v46, %v1593_v42  ;;  %v437_v50 = vpop.f32.mrb[11].mxu1  ;;  %v1576_v57 = vpop.f32.mrb[10].mxu0 }
  0xf0   :  { %v469_v52 = vpack.c.bf16 %v437_v50, %v434_v44  ;;  %v219_v59 = vpack.c.bf16 %v1576_v57, %v1575_v53  ;;  %v186_v60 = vpop.f32.mrb[11].mxu0  ;;  %v2053_v57 = vld [vmem:[#allocation3 + $0x10] sm:$0xff] }
  0xf1   :  { %v218_v63 = vpack.c.bf16 %v186_v60, %v183_v55 }
  0xf3   :  { %1622 = vmatpush3.bf16.xpose.msra.mxu1 %v467_v40  ;;  %v1802_v40 = vmov 0.0  }
  0xf4   :  { %1623 = vmatprep.subr.bf16.mxu1 %v468_v37  ;;  %v1597_v54 = vpop.f32.mrb[12].mxu1  ;;  %249 = vst.msk [vmem:[#allocation4 + $0x10] sm:$0xff] %vm230_vm3, %v1802_v40  ;;  %247 = vst.msk [vmem:[#allocation4] sm:$0xff] %vm230_vm3, %v1802_v40 }
  0xf5   :  { %v450_v56 = vpop.f32.mrb[13].mxu1  ;;  %v1579_v1 = vpop.f32.mrb[12].mxu0  ;;  %248 = vst.msk [vmem:[#allocation4 + $0x8] sm:$0xff] %vm230_vm3, %v1802_v40  ;;  %250 = vst.msk [vmem:[#allocation4 + $0x18] sm:$0xff] %vm230_vm3, %v1802_v40 }
  0xf6   :  { %v1598_v58 = vpop.f32.mrb[14].mxu1  ;;  %v199_v2 = vpop.f32.mrb[13].mxu0  ;;  %251 = vst.msk [vmem:[#allocation4 + $0x20] sm:$0xff] %vm230_vm3, %v1802_v40  ;;  %252 = vst.msk [vmem:[#allocation4 + $0x28] sm:$0xff] %vm230_vm3, %v1802_v40 }
  0xf7   :  { %v472_v61 = vpack.c.bf16 %v1598_v58, %v1597_v54  ;;  %v453_v62 = vpop.f32.mrb[15].mxu1  ;;  %v1580_v3 = vpop.f32.mrb[14].mxu0  ;;  %253 = vst.msk [vmem:[#allocation4 + $0x30] sm:$0xff] %vm230_vm3, %v1802_v40  ;;  %254 = vst.msk [vmem:[#allocation4 + $0x38] sm:$0xff] %vm230_vm3, %v1802_v40  ;;  %v2055_v58 = vld [vmem:[#allocation3] sm:$0xff] }
  0xf8   :  { %v471_v0 = vpack.c.bf16 %v453_v62, %v450_v56  ;;  %v221_v5 = vpack.c.bf16 %v1580_v3, %v1579_v1  ;;  %v202_v8 = vpop.f32.mrb[15].mxu0  ;;  %255 = vst.msk [vmem:[#allocation4 + $0x40] sm:$0xff] %vm230_vm3, %v1802_v40  ;;  %256 = vst.msk [vmem:[#allocation4 + $0x48] sm:$0xff] %vm230_vm3, %v1802_v40  ;;  %v2070_v1 = vld [vmem:[#allocation3 + $0x8] sm:$0xff] }
  0xf9   :  { %v220_v9 = vpack.c.bf16 %v202_v8, %v199_v2  ;;  %257 = vst.msk [vmem:[#allocation4 + $0x50] sm:$0xff] %vm230_vm3, %v1802_v40  ;;  %258 = vst.msk [vmem:[#allocation4 + $0x58] sm:$0xff] %vm230_vm3, %v1802_v40 }
  0xfa   :  { %259 = vst.msk [vmem:[#allocation4 + $0x60] sm:$0xff] %vm230_vm3, %v1802_v40  ;;  %260 = vst.msk [vmem:[#allocation4 + $0x68] sm:$0xff] %vm230_vm3, %v1802_v40 }
  0xfb   :  { %1624 = vmatpush3.bf16.xpose.msra.mxu1 %v468_v37  ;;  %261 = vst.msk [vmem:[#allocation4 + $0x70] sm:$0xff] %vm230_vm3, %v1802_v40  ;;  %262 = vst.msk [vmem:[#allocation4 + $0x78] sm:$0xff] %vm230_vm3, %v1802_v40 }
  0xfc   :  { %1625 = vmatprep.subr.bf16.mxu1 %v469_v52 }
  0xfd   :  { %v1603_v45 = vpop.f32.mrb[16].mxu0 }
  0xfe   :  { %v511_v46 = vpop.f32.mrb[17].mxu0 }
 0x103   :  { %1626 = vmatpush3.bf16.xpose.msra.mxu1 %v469_v52 }
 0x104   :  { %1627 = vmatprep.subr.bf16.mxu1 %v470_v49 }
 0x10b   :  { %1628 = vmatpush3.bf16.xpose.msra.mxu1 %v470_v49 }
 0x10c   :  { %1629 = vmatprep.subr.bf16.mxu1 %v471_v0 }
 0x113   :  { %1630 = vmatpush3.bf16.xpose.msra.mxu1 %v471_v0 }
 0x114   :  { %1631 = vmatprep.subr.bf16.mxu1 %v472_v61 }
 0x11b   :  { %1632 = vmatpush3.bf16.xpose.msra.mxu1 %v472_v61 }
 0x122   :  { %1634 = vmatmul.mubr.bf16.vlgmr.msra.gmra.mrb[16].mxu1 %v215_v35 }
 0x123   :  { %1637 = vmatprep.mubr.bf16.mxu1 %v216_v51 }
 0x12a   :  { %1638 = vmatmul.mubr.bf16.gmra.mrb[20].mxu1 %v217_v47  ;;  %v1604_v47 = vpop.f32.mrb[18].mxu0 }
 0x12b   :  { %1641 = vmatprep.mubr.bf16.mxu1 %v218_v63  ;;  %v575_v48 = vpack.c.bf16 %v1604_v47, %v1603_v45  ;;  %v514_v49 = vpop.f32.mrb[19].mxu0  ;;  %v2063_v63 = vld [vmem:[#allocation3 + $0x18] sm:$0xff]  ;;  %v2121_v45 = vld [vmem:[#allocation3 + $0x40] sm:$0xff] }
 0x12c   :  { %v574_v50 = vpack.c.bf16 %v514_v49, %v511_v46  ;;  %v1607_v51 = vpop.f32.mrb[20].mxu0 }
 0x12d   :  { %v527_v52 = vpop.f32.mrb[21].mxu0 }
 0x12e   :  { %1649 = vmatprep.subr.bf16.mxu0 %v574_v50  ;;  %v1608_v53 = vpop.f32.mrb[22].mxu0 }
 0x12f   :  { %1650 = vmatpush3.bf16.msra.mxu0 %v574_v50  ;;  %v577_v54 = vpack.c.bf16 %v1608_v53, %v1607_v51  ;;  %v530_v55 = vpop.f32.mrb[23].mxu0 }
 0x130   :  { %1651 = vmatprep.subr.bf16.mxu0 %v575_v48  ;;  %v576_v56 = vpack.c.bf16 %v530_v55, %v527_v52  ;;  %v1611_v13 = vpop.f32.mrb[24].mxu0 }
 0x132   :  { %1642 = vmatmul.mubr.bf16.gmra.mrb[24].mxu1 %v219_v59 }
 0x133   :  { %1645 = vmatprep.mubr.bf16.mxu1 %v220_v9  ;;  %1652 = vmatpush3.bf16.msra.mxu0 %v575_v48  ;;  %v2128_v48 = vld [vmem:[#allocation3 + $0x58] sm:$0xff] }
 0x134   :  { %1653 = vmatprep.subr.bf16.mxu0 %v576_v56 }
 0x137   :  { %1654 = vmatpush3.bf16.msra.mxu0 %v576_v56 }
 0x138   :  { %1655 = vmatprep.subr.bf16.mxu0 %v577_v54 }
 0x13a   :  { %1646 = vmatmul.mubr.bf16.gmra.mrb[28].mxu1 %v221_v5 }
 0x13b   :  { %1656 = vmatpush3.bf16.msra.mxu0 %v577_v54 }
 0x1f5   :  { %v1635_v6 = vpop.f32.mrb[16].mxu1 }
 0x1f6   :  { %v1974_v7 = vadd.f32 %v1635_v6, %v1971_v4  ;;  %v631_v11 = vpop.f32.mrb[17].mxu1  ;;  %v2094_v6 = vld [vmem:[#allocation3 + $0x38] sm:$0xff] }
 0x1f7   :  { %v1977_v14 = vadd.f32 %v1971_v4, %v631_v11  ;;  %v1636_v15 = vpop.f32.mrb[18].mxu1  ;;  %v543_v11 = vpop.f32.mrb[25].mxu0 }
 0x1f8   :  { %714 = vmax.xlane.f32.xlu1 %v1974_v7  ;;  %v634_v16 = vpop.f32.mrb[19].mxu1  ;;  %v1982_v17 = vadd.f32 %v1636_v15, %v1971_v4 }
 0x1f9   :  { %710 = vmax.xlane.f32.xlu0 %v1977_v14  ;;  %v1985_v18 = vadd.f32 %v1971_v4, %v634_v16  ;;  %v1612_v16 = vpop.f32.mrb[26].mxu0 }
 0x1fc   :  { %716 = vmax.xlane.f32.xlu1 %v1982_v17 }
 0x1fd   :  { %712 = vmax.xlane.f32.xlu0 %v1985_v18  ;;  %v1639_v19 = vpop.f32.mrb[20].mxu1 }
 0x1fe   :  { %v647_v20 = vpop.f32.mrb[21].mxu1  ;;  %v1998_v25 = vadd.f32 %v1639_v19, %v1971_v4 }
 0x1ff   :  { %v1990_v21 = vadd.f32 %v1971_v4, %v647_v20  ;;  %v1640_v22 = vpop.f32.mrb[22].mxu1 }
 0x200   :  { %v1993_v23 = vadd.f32 %v1640_v22, %v1971_v4  ;;  %v650_v24 = vpop.f32.mrb[23].mxu1  ;;  %v546_v22 = vpop.f32.mrb[27].mxu0 }
 0x201   :  { %718 = vmax.xlane.f32.xlu0 %v1990_v21  ;;  %v2001_v26 = vadd.f32 %v1971_v4, %v650_v24  ;;  %v1615_v46 = vpop.f32.mrb[28].mxu0 }
 0x202   :  { %724 = vmax.xlane.f32.xlu1 %v1993_v23  ;;  %v559_v49 = vpop.f32.mrb[29].mxu0 }
 0x203   :  { %v1616_v52 = vpop.f32.mrb[30].mxu0 }
 0x204   :  { %v562_v55 = vpop.f32.mrb[31].mxu0 }
 0x205   :  { %722 = vmax.xlane.f32.xlu0 %v1998_v25  ;;  %v1643_v27 = vpop.f32.mrb[24].mxu1 }
 0x206   :  { %720 = vmax.xlane.f32.xlu1 %v2001_v26  ;;  %v663_v28 = vpop.f32.mrb[25].mxu1  ;;  %v2014_v34 = vadd.f32 %v1643_v27, %v1971_v4  ;;  %v2103_v27 = vld [vmem:[#allocation3 + $0x30] sm:$0xff] }
 0x207   :  { %v2006_v29 = vadd.f32 %v1971_v4, %v663_v28  ;;  %v1644_v30 = vpop.f32.mrb[26].mxu1  ;;  %v579_v28 = vpack.c.bf16 %v1612_v16, %v1611_v13  ;;  %v581_v13 = vpack.c.bf16 %v1616_v52, %v1615_v46 }
 0x208   :  { %v2009_v32 = vadd.f32 %v1644_v30, %v1971_v4  ;;  %v666_v33 = vpop.f32.mrb[27].mxu1  ;;  %v578_v30 = vpack.c.bf16 %v546_v22, %v543_v11 }
 0x209   :  { %726 = vmax.xlane.f32.xlu0 %v2006_v29  ;;  %v2017_v35 = vadd.f32 %v1971_v4, %v666_v33  ;;  %v2109_v33 = vld [vmem:[#allocation3 + $0x28] sm:$0xff] }
 0x20a   :  { %732 = vmax.xlane.f32.xlu1 %v2009_v32  ;;  %1657 = vmatprep.subr.bf16.mxu0 %v578_v30 }
 0x20b   :  { %1658 = vmatpush3.bf16.msra.mxu0 %v578_v30 }
 0x20c   :  { %1659 = vmatprep.subr.bf16.mxu0 %v579_v28 }
 0x20d   :  { %730 = vmax.xlane.f32.xlu0 %v2014_v34  ;;  %v1647_v36 = vpop.f32.mrb[28].mxu1 }
 0x20e   :  { %728 = vmax.xlane.f32.xlu1 %v2017_v35  ;;  %v679_v37 = vpop.f32.mrb[29].mxu1  ;;  %v2046_v43 = vadd.f32 %v1647_v36, %v1971_v4 }
 0x20f   :  { %v2022_v38 = vadd.f32 %v1971_v4, %v679_v37  ;;  %v1648_v39 = vpop.f32.mrb[30].mxu1  ;;  %1660 = vmatpush3.bf16.msra.mxu0 %v579_v28  ;;  %v2159_v28 = vld [vmem:[#allocation3 + $0x60] sm:$0xff] }
 0x210   :  { %v2041_v41 = vadd.f32 %v1648_v39, %v1971_v4  ;;  %v682_v42 = vpop.f32.mrb[31].mxu1 }
 0x211   :  { %734 = vmax.xlane.f32.xlu0 %v2022_v38  ;;  %v2049_v44 = vadd.f32 %v1971_v4, %v682_v42 }
 0x212   :  { %740 = vmax.xlane.f32.xlu1 %v2041_v41 }
 0x215   :  { %738 = vmax.xlane.f32.xlu0 %v2046_v43 }
 0x216   :  { %736 = vmax.xlane.f32.xlu1 %v2049_v44 }
 0x285   :  { %v715_v59 = vpop.xlane.xlu1 %714 }
 0x286   :  { %v2058_v60 = vmax.f32 %v2053_v57, %v715_v59  ;;  %v711_v61 = vpop.xlane.xlu0 %710  ;;  %v2140_v59 = vld [vmem:[#allocation3 + $0x50] sm:$0xff] }
 0x287   :  { %v2061_v62 = vmax.f32 %v2055_v58, %v711_v61  ;;  %v580_v61 = vpack.c.bf16 %v562_v55, %v559_v49 }
 0x288   :  { %v760_v0 = vsub.f32 %v2053_v57, %v2058_v60  ;;  %1282 = vst.msk [vmem:[#allocation3 + $0x10] sm:$0xff] %vm230_vm3, %v2058_v60  ;;  %818 = vperm.xlu1 %1686, %v2058_v60  }
 0x289   :  { %1280 = vst.msk [vmem:[#allocation3] sm:$0xff] %vm230_vm3, %v2061_v62  ;;  %v717_v3 = vpop.xlane.xlu1 %716  ;;  %808 = vperm.xlu0 %1685, %v2061_v62   ;;  %1661 = vmatprep.subr.bf16.mxu0 %v580_v61 }
 0x28a   :  { %v2078_v5 = vmax.f32 %v2063_v63, %v717_v3  ;;  %v713_v8 = vpop.xlane.xlu0 %712  ;;  %1662 = vmatpush3.bf16.msra.mxu0 %v580_v61  ;;  %v2186_v61 = vld [vmem:[#allocation3 + $0x68] sm:$0xff] }
 0x28b   :  { %v2081_v9 = vmax.f32 %v2070_v1, %v713_v8  ;;  %v2147_v8 = vld [vmem:[#allocation3 + $0x48] sm:$0xff]  ;;  %1663 = vmatprep.subr.bf16.mxu0 %v581_v13 }
 0x28c   :  { %1283 = vst.msk [vmem:[#allocation3 + $0x18] sm:$0xff] %vm230_vm3, %v2078_v5  ;;  %823 = vperm.xlu1 %1686, %v2078_v5  }
 0x28d   :  { %v759_v4 = vsub.f32 %v2070_v1, %v2081_v9  ;;  %1281 = vst.msk [vmem:[#allocation3 + $0x8] sm:$0xff] %vm230_vm3, %v2081_v9 }
 0x28e   :  { %v719_v15 = vpop.xlane.xlu0 %718  ;;  %1664 = vmatpush3.bf16.msra.mxu0 %v581_v13 }
 0x28f   :  { %v2097_v19 = vmax.f32 %v2088_v12, %v719_v15  ;;  %v725_v20 = vpop.xlane.xlu1 %724 }
 0x290   :  { %v2100_v24 = vmax.f32 %v2094_v6, %v725_v20  ;;  %813 = vperm.xlu1 %1686, %v2081_v9  }
 0x291   :  { %1284 = vst.msk [vmem:[#allocation3 + $0x20] sm:$0xff] %vm230_vm3, %v2097_v19 }
 0x292   :  { %1287 = vst.msk [vmem:[#allocation3 + $0x38] sm:$0xff] %vm230_vm3, %v2100_v24  ;;  %v723_v37 = vpop.xlane.xlu0 %722 }
 0x293   :  { %v2116_v39 = vmax.f32 %v2103_v27, %v723_v37  ;;  %v721_v40 = vpop.xlane.xlu1 %720  ;;  %v2166_v37 = vld [vmem:[#allocation3 + $0x78] sm:$0xff] }
 0x294   :  { %v2119_v42 = vmax.f32 %v2109_v33, %v721_v40 }
 0x295   :  { %1286 = vst.msk [vmem:[#allocation3 + $0x30] sm:$0xff] %vm230_vm3, %v2116_v39  ;;  %838 = vperm.xlu1 %1686, %v2116_v39   ;;  %v2432_v57 = vsub.f32 %v2103_v27, %v2116_v39 }
 0x296   :  { %1285 = vst.msk [vmem:[#allocation3 + $0x28] sm:$0xff] %vm230_vm3, %v2119_v42  ;;  %v727_v51 = vpop.xlane.xlu0 %726 }
 0x297   :  { %v2135_v53 = vmax.f32 %v2121_v45, %v727_v51  ;;  %v733_v54 = vpop.xlane.xlu1 %732  ;;  %v786_v60 = vmul.f32 1.442695, %v2432_v57 }
 0x298   :  { %v2138_v56 = vmax.f32 %v2128_v48, %v733_v54  ;;  %v2179_v54 = vld [vmem:[#allocation3 + $0x70] sm:$0xff] }
 0x299   :  { %1288 = vst.msk [vmem:[#allocation3 + $0x40] sm:$0xff] %vm230_vm3, %v2135_v53  ;;  %828 = vperm.xlu1 %1686, %v2097_v19   ;;  %v2434_v9 = vsub.f32 %v2121_v45, %v2135_v53 }
 0x29a   :  { %1291 = vst.msk [vmem:[#allocation3 + $0x58] sm:$0xff] %vm230_vm3, %v2138_v56  ;;  %v731_v15 = vpop.xlane.xlu0 %730 }
 0x29b   :  { %v2154_v16 = vmax.f32 %v2140_v59, %v731_v15  ;;  %v729_v20 = vpop.xlane.xlu1 %728 }
 0x29c   :  { %v2157_v22 = vmax.f32 %v2147_v8, %v729_v20 }
 0x29d   :  { %1290 = vst.msk [vmem:[#allocation3 + $0x50] sm:$0xff] %vm230_vm3, %v2154_v16  ;;  %833 = vperm.xlu1 %1686, %v2119_v42   ;;  %v2436_v27 = vsub.f32 %v2140_v59, %v2154_v16  ;;  %v2439_v59 = vsub.f32 %v2128_v48, %v2138_v56 }
 0x29e   :  { %1289 = vst.msk [vmem:[#allocation3 + $0x48] sm:$0xff] %vm230_vm3, %v2157_v22  ;;  %853 = vperm.xlu0 %1685, %v2157_v22   ;;  %v735_v46 = vpop.xlane.xlu0 %734  ;;  %v2437_v39 = vsub.f32 %v2147_v8, %v2157_v22 }
 0x29f   :  { %v2174_v49 = vmax.f32 %v2159_v28, %v735_v46  ;;  %v741_v51 = vpop.xlane.xlu1 %740 }
 0x2a0   :  { %v2177_v52 = vmax.f32 %v2166_v37, %v741_v51 }
 0x2a1   :  { %1292 = vst.msk [vmem:[#allocation3 + $0x60] sm:$0xff] %vm230_vm3, %v2174_v49  ;;  %843 = vperm.xlu1 %1686, %v2100_v24  }
 0x2a2   :  { %1295 = vst.msk [vmem:[#allocation3 + $0x78] sm:$0xff] %vm230_vm3, %v2177_v52  ;;  %863 = vperm.xlu0 %1685, %v2138_v56   ;;  %v739_v13 = vpop.xlane.xlu0 %738  ;;  %v2442_v56 = vsub.f32 %v2166_v37, %v2177_v52 }
 0x2a3   :  { %v2194_v20 = vmax.f32 %v2179_v54, %v739_v13  ;;  %v737_v46 = vpop.xlane.xlu1 %736 }
 0x2a4   :  { %v2197_v51 = vmax.f32 %v2186_v61, %v737_v46 }
 0x2a5   :  { %1294 = vst.msk [vmem:[#allocation3 + $0x70] sm:$0xff] %vm230_vm3, %v2194_v20  ;;  %848 = vperm.xlu1 %1686, %v2135_v53   ;;  %v2440_v8 = vsub.f32 %v2179_v54, %v2194_v20  ;;  %v804_v54 = vmul.f32 1.442695, %v2442_v56 }
 0x2a6   :  { %1293 = vst.msk [vmem:[#allocation3 + $0x68] sm:$0xff] %vm230_vm3, %v2197_v51  ;;  %873 = vperm.xlu0 %1685, %v2197_v51  }
 0x2a7   :  { %v802_v22 = vmul.f32 1.442695, %v2440_v8  ;;  %v943_v8 = vld [vmem:[#allocation4 + $0x48] sm:$0xff] }
 0x2a9   :  { %858 = vperm.xlu1 %1686, %v2154_v16   ;;  %v796_v16 = vmul.f32 1.442695, %v2439_v59 }
 0x2aa   :  { %883 = vperm.xlu0 %1685, %v2177_v52  }
 0x2ad   :  { %868 = vperm.xlu1 %1686, %v2174_v49  }
 0x2b1   :  { %878 = vperm.xlu1 %1686, %v2194_v20  }
 0x307   :  { %v819_v13 = vpop.permute.xlu1 %818 }
 0x308   :  { %v888_v46 = vsub.f32 %v1974_v7, %v819_v13  ;;  %v809_v11 = vpop.permute.xlu0 %808 }
 0x309   :  { %v886_v55 = vsub.f32 %v1977_v14, %v809_v11 }
 0x30a   :  { %v906_v15 = vmul.f32 1.442695, %v888_v46 }
 0x30b   :  { %v902_v40 = vmul.f32 1.442695, %v886_v55  ;;  %v824_v30 = vpop.permute.xlu1 %823 }
 0x30c   :  { %1703 = vpow2.f32 %v906_v15  ;;  %v889_v36 = vsub.f32 %v1982_v17, %v824_v30 }
 0x30d   :  { %1705 = vpow2.f32 %v902_v40 }
 0x30e   :  { %v908_v3 = vmul.f32 1.442695, %v889_v36 }
 0x30f   :  { %v814_v50 = vpop.permute.xlu1 %813 }
 0x310   :  { %1707 = vpow2.f32 %v908_v3  ;;  %v887_v47 = vsub.f32 %v1985_v18, %v814_v50 }
 0x312   :  { %v904_v10 = vmul.f32 1.442695, %v887_v47 }
 0x314   :  { %1709 = vpow2.f32 %v904_v10  ;;  %v839_v31 = vpop.permute.xlu1 %838 }
 0x315   :  { %v892_v7 = vsub.f32 %v1998_v25, %v839_v31 }
 0x316   :  { %v1704_v13 = vpop.eup %1703 }
 0x317   :  { %v1706_v2 = vpop.eup %1705  ;;  %v914_v14 = vmul.f32 1.442695, %v892_v7  ;;  %970 = vadd.xlane.f32.xlu0 %v1704_v13 }
 0x318   :  { %v829_v11 = vpop.permute.xlu1 %828  ;;  %966 = vadd.xlane.f32.xlu1 %v1706_v2 }
 0x319   :  { %1711 = vpow2.f32 %v914_v14  ;;  %v890_v17 = vsub.f32 %v1990_v21, %v829_v11 }
 0x31a   :  { %v1708_v30 = vpop.eup %1707 }
 0x31b   :  { %v910_v36 = vmul.f32 1.442695, %v890_v17  ;;  %v1144_v55 = vpack.c.bf16 %v1708_v30, %v1704_v13 }
 0x31c   :  { %v834_v40 = vpop.permute.xlu1 %833  ;;  %972 = vadd.xlane.f32.xlu1 %v1708_v30 }
 0x31d   :  { %1713 = vpow2.f32 %v910_v36  ;;  %v891_v18 = vsub.f32 %v2001_v26, %v834_v40  ;;  %v854_v10 = vpop.permute.xlu0 %853 }
 0x31e   :  { %v1710_v47 = vpop.eup %1709  ;;  %v895_v31 = vsub.f32 %v2017_v35, %v854_v10 }
 0x31f   :  { %v912_v50 = vmul.f32 1.442695, %v891_v18  ;;  %968 = vadd.xlane.f32.xlu0 %v1710_v47  ;;  %v1143_v25 = vpack.c.bf16 %v1710_v47, %v1706_v2 }
 0x320   :  { %v844_v3 = vpop.permute.xlu1 %843  ;;  %v920_v14 = vmul.f32 1.442695, %v895_v31 }
 0x321   :  { %1715 = vpow2.f32 %v912_v50  ;;  %v893_v15 = vsub.f32 %v1993_v23, %v844_v3  ;;  %1665 = vmatprep.mubr.bf16.mxu0 %v1143_v25  ;;  %v864_v21 = vpop.permute.xlu0 %863 }
 0x322   :  { %1666 = vmatmul.mubr.bf16.vlgmr.msra.gmra.mrb[32].mxu0 %v1144_v55  ;;  %v897_v26 = vsub.f32 %v2009_v32, %v864_v21 }
 0x323   :  { %v1712_v46 = vpop.eup %1711  ;;  %v916_v7 = vmul.f32 1.442695, %v893_v15 }
 0x324   :  { %v849_v11 = vpop.permute.xlu1 %848  ;;  %978 = vadd.xlane.f32.xlu0 %v1712_v46  ;;  %v924_v13 = vmul.f32 1.442695, %v897_v26 }
 0x325   :  { %1717 = vpow2.f32 %v916_v7  ;;  %v894_v2 = vsub.f32 %v2006_v29, %v849_v11  ;;  %v874_v17 = vpop.permute.xlu0 %873 }
 0x326   :  { %1719 = vpow2.f32 %v920_v14  ;;  %v899_v23 = vsub.f32 %v2049_v44, %v874_v17 }
 0x327   :  { %v1714_v35 = vpop.eup %1713  ;;  %v918_v36 = vmul.f32 1.442695, %v894_v2 }
 0x328   :  { %v859_v30 = vpop.permute.xlu1 %858  ;;  %974 = vadd.xlane.f32.xlu0 %v1714_v35  ;;  %v928_v47 = vmul.f32 1.442695, %v899_v23  ;;  %v776_v23 = vmul.f32 1.442695, %v759_v4 }
 0x329   :  { %1721 = vpow2.f32 %v918_v36  ;;  %v896_v40 = vsub.f32 %v2014_v34, %v859_v30  ;;  %v884_v18 = vpop.permute.xlu0 %883  ;;  %v778_v30 = vmul.f32 1.442695, %v760_v0 }
 0x32a   :  { %1723 = vpow2.f32 %v924_v13  ;;  %v901_v50 = vsub.f32 %v2041_v41, %v884_v18 }
 0x32b   :  { %v1716_v10 = vpop.eup %1715  ;;  %v922_v32 = vmul.f32 1.442695, %v896_v40  ;;  %v2429_v40 = vsub.f32 %v2055_v58, %v2061_v62  ;;  %v2433_v58 = vsub.f32 %v2109_v33, %v2119_v42  ;;  %v794_v33 = vmul.f32 1.442695, %v2436_v27 }
 0x32c   :  { %v869_v29 = vpop.permute.xlu1 %868  ;;  %v1145_v25 = vpack.c.bf16 %v1716_v10, %v1714_v35  ;;  %v932_v55 = vmul.f32 1.442695, %v901_v50  ;;  %v792_v42 = vmul.f32 1.442695, %v2437_v39 }
 0x32d   :  { %1725 = vpow2.f32 %v922_v32  ;;  %v898_v31 = vsub.f32 %v2022_v38, %v869_v29  ;;  %v774_v18 = vmul.f32 1.442695, %v2429_v40  ;;  %v784_v62 = vmul.f32 1.442695, %v2433_v58 }
 0x32e   :  { %1669 = vmatprep.mubr.bf16.mxu0 %v1145_v25  ;;  %1727 = vpow2.f32 %v928_v47  ;;  %v2431_v47 = vsub.f32 %v2063_v63, %v2078_v5  ;;  %v790_v63 = vmul.f32 1.442695, %v2434_v9  ;;  %v2435_v5 = vsub.f32 %v2094_v6, %v2100_v24 }
 0x32f   :  { %v1718_v3 = vpop.eup %1717  ;;  %v926_v44 = vmul.f32 1.442695, %v898_v31  ;;  %v2438_v6 = vsub.f32 %v2159_v28, %v2174_v49  ;;  %v2441_v28 = vsub.f32 %v2186_v61, %v2197_v51 }
 0x330   :  { %v879_v15 = vpop.permute.xlu1 %878  ;;  %980 = vadd.xlane.f32.xlu1 %v1718_v3  ;;  %v1146_v34 = vpack.c.bf16 %v1718_v3, %v1712_v46  ;;  %v1720_v7 = vpop.eup %1719  ;;  %v780_v1 = vmul.f32 1.442695, %v2431_v47 }
 0x331   :  { %1729 = vpow2.f32 %v926_v44  ;;  %v900_v21 = vsub.f32 %v2046_v43, %v879_v15  ;;  %v798_v24 = vmul.f32 1.442695, %v2438_v6  ;;  %v800_v49 = vmul.f32 1.442695, %v2441_v28  ;;  %v936_v44 = vld [vmem:[#allocation4 + $0x10] sm:$0xff] }
 0x332   :  { %1670 = vmatmul.mubr.bf16.gmra.mrb[36].mxu0 %v1146_v34  ;;  %1731 = vpow2.f32 %v932_v55  ;;  %v934_v55 = vld [vmem:[#allocation4] sm:$0xff] }
 0x333   :  { %v1722_v14 = vpop.eup %1721  ;;  %v930_v41 = vmul.f32 1.442695, %v900_v21 }
 0x334   :  { %976 = vadd.xlane.f32.xlu1 %v1716_v10  ;;  %v1147_v26 = vpack.c.bf16 %v1720_v7, %v1722_v14  ;;  %v1724_v38 = vpop.eup %1723  ;;  %v2430_v10 = vsub.f32 %v2088_v12, %v2097_v19  ;;  %v788_v12 = vmul.f32 1.442695, %v2435_v5 }
 0x335   :  { %1733 = vpow2.f32 %v930_v41  ;;  %v937_v41 = vld [vmem:[#allocation4 + $0x18] sm:$0xff] }
 0x336   :  { %1673 = vmatprep.mubr.bf16.mxu0 %v1147_v26  ;;  %1735 = vpow2.f32 %v776_v23  ;;  %v782_v32 = vmul.f32 1.442695, %v2430_v10 }
 0x337   :  { %v1726_v11 = vpop.eup %1725  ;;  %1737 = vpow2.f32 %v778_v30 }
 0x338   :  { %986 = vadd.xlane.f32.xlu0 %v1726_v11  ;;  %988 = vadd.xlane.f32.xlu1 %v1724_v38  ;;  %v1148_v2 = vpack.c.bf16 %v1724_v38, %v1726_v11  ;;  %v1728_v17 = vpop.eup %1727  ;;  %1739 = vpow2.f32 %v774_v18  ;;  %v935_v11 = vld [vmem:[#allocation4 + $0x8] sm:$0xff]  ;;  %v938_v18 = vld [vmem:[#allocation4 + $0x20] sm:$0xff] }
 0x339   :  { %1741 = vpow2.f32 %v782_v32 }
 0x33a   :  { %1674 = vmatmul.mubr.bf16.gmra.mrb[40].mxu0 %v1148_v2  ;;  %1743 = vpow2.f32 %v780_v1 }
 0x33b   :  { %v1730_v46 = vpop.eup %1729  ;;  %1745 = vpow2.f32 %v786_v60 }
 0x33c   :  { %982 = vadd.xlane.f32.xlu0 %v1722_v14  ;;  %984 = vadd.xlane.f32.xlu1 %v1720_v7  ;;  %v1149_v43 = vpack.c.bf16 %v1728_v17, %v1730_v46  ;;  %v1732_v35 = vpop.eup %1731  ;;  %1747 = vpow2.f32 %v784_v62  ;;  %v941_v62 = vld [vmem:[#allocation4 + $0x38] sm:$0xff] }
 0x33d   :  { %1749 = vpow2.f32 %v790_v63 }
 0x33e   :  { %1677 = vmatprep.mubr.bf16.mxu0 %v1149_v43  ;;  %1751 = vpow2.f32 %v788_v12  ;;  %v939_v12 = vld [vmem:[#allocation4 + $0x28] sm:$0xff] }
 0x33f   :  { %v1734_v36 = vpop.eup %1733  ;;  %1753 = vpow2.f32 %v794_v33 }
 0x340   :  { %990 = vadd.xlane.f32.xlu0 %v1730_v46  ;;  %996 = vadd.xlane.f32.xlu1 %v1732_v35  ;;  %v1150_v13 = vpack.c.bf16 %v1732_v35, %v1734_v36  ;;  %v2250_v0 = vpop.eup %1735  ;;  %1755 = vpow2.f32 %v792_v42 }
 0x341   :  { %v1738_v4 = vpop.eup %1737  ;;  %1757 = vpow2.f32 %v798_v24  ;;  %v951_v46 = vmul.f32 %v2250_v0, %v935_v11 }
 0x342   :  { %1678 = vmatmul.mubr.bf16.gmra.mrb[44].mxu0 %v1150_v13  ;;  %v1740_v19 = vpop.eup %1739  ;;  %1759 = vpow2.f32 %v796_v16  ;;  %v952_v15 = vmul.f32 %v1738_v4, %v936_v44  ;;  %v949_v44 = vld [vmem:[#allocation4 + $0x78] sm:$0xff] }
 0x343   :  { %v2265_v45 = vpop.eup %1741  ;;  %1761 = vpow2.f32 %v802_v22  ;;  %v950_v21 = vmul.f32 %v1740_v19, %v934_v55  ;;  %v942_v22 = vld [vmem:[#allocation4 + $0x40] sm:$0xff] }
 0x344   :  { %994 = vadd.xlane.f32.xlu0 %v1734_v36  ;;  %992 = vadd.xlane.f32.xlu1 %v1728_v17  ;;  %v1744_v53 = vpop.eup %1743  ;;  %1763 = vpow2.f32 %v800_v49  ;;  %v940_v36 = vld [vmem:[#allocation4 + $0x30] sm:$0xff]  ;;  %v954_v47 = vmul.f32 %v2265_v45, %v938_v18  ;;  %v946_v55 = vld [vmem:[#allocation4 + $0x60] sm:$0xff] }
 0x345   :  { %v1746_v50 = vpop.eup %1745  ;;  %1765 = vpow2.f32 %v804_v54  ;;  %v953_v38 = vmul.f32 %v1744_v53, %v937_v41 }
 0x346   :  { %v2274_v29 = vpop.eup %1747  ;;  %v956_v23 = vmul.f32 %v1746_v50, %v940_v36 }
 0x347   :  { %v2283_v25 = vpop.eup %1749  ;;  %v955_v33 = vmul.f32 %v2274_v29, %v939_v12 }
 0x348   :  { %v2285_v48 = vpop.eup %1751  ;;  %v958_v54 = vmul.f32 %v2283_v25, %v942_v22 }
 0x349   :  { %v2292_v20 = vpop.eup %1753  ;;  %v957_v9 = vmul.f32 %v2285_v48, %v941_v62 }
 0x34a   :  { %v2294_v31 = vpop.eup %1755 }
 0x34b   :  { %v2298_v61 = vpop.eup %1757  ;;  %v959_v56 = vmul.f32 %v2294_v31, %v943_v8 }
 0x34c   :  { %v2300_v51 = vpop.eup %1759 }
 0x34d   :  { %v2304_v37 = vpop.eup %1761 }
 0x34e   :  { %v2306_v52 = vpop.eup %1763 }
 0x34f   :  { %v2310_v3 = vpop.eup %1765 }
 0x355   :  { %1054 = vperm.xlu1 %1686, %v2250_v0  }
 0x359   :  { %1059 = vperm.xlu1 %1686, %v1738_v4  }
 0x35a   :  { %1049 = vperm.xlu0 %1685, %v1740_v19  }
 0x35d   :  { %1069 = vperm.xlu1 %1686, %v2265_v45   ;;  %v945_v45 = vld [vmem:[#allocation4 + $0x58] sm:$0xff] }
 0x35e   :  { %1064 = vperm.xlu0 %1685, %v1744_v53   ;;  %v944_v53 = vld [vmem:[#allocation4 + $0x50] sm:$0xff]  ;;  %v961_v24 = vmul.f32 %v2300_v51, %v945_v45 }
 0x35f   :  { %v960_v59 = vmul.f32 %v2292_v20, %v944_v53 }
 0x361   :  { %1079 = vperm.xlu1 %1686, %v1746_v50  }
 0x362   :  { %1074 = vperm.xlu0 %1685, %v2274_v29  }
 0x365   :  { %1089 = vperm.xlu1 %1686, %v2283_v25  }
 0x366   :  { %1084 = vperm.xlu0 %1685, %v2285_v48  }
 0x369   :  { %1099 = vperm.xlu1 %1686, %v2292_v20  }
 0x36a   :  { %1094 = vperm.xlu0 %1685, %v2294_v31   ;;  %v962_v31 = vmul.f32 %v2298_v61, %v946_v55 }
 0x36d   :  { %1109 = vperm.xlu1 %1686, %v2298_v61  }
 0x36e   :  { %1104 = vperm.xlu0 %1685, %v2300_v51  }
 0x371   :  { %1119 = vperm.xlu1 %1686, %v2304_v37  }
 0x372   :  { %1114 = vperm.xlu0 %1685, %v2306_v52  }
 0x376   :  { %1124 = vperm.xlu0 %1685, %v2310_v3  }
 0x3a4   :  { %v971_v34 = vpop.xlane.xlu0 %970 }
 0x3a5   :  { %v1000_v7 = vadd.f32 %v971_v34, %v952_v15  ;;  %v967_v14 = vpop.xlane.xlu1 %966 }
 0x3a6   :  { %v998_v26 = vadd.f32 %v967_v14, %v950_v21  ;;  %v965_v14 = vmul.f32 %v2310_v3, %v949_v44 }
 0x3a7   :  { %1017 = vst.msk [vmem:[#allocation4 + $0x10] sm:$0xff] %vm230_vm3, %v1000_v7 }
 0x3a8   :  { %1015 = vst.msk [vmem:[#allocation4] sm:$0xff] %vm230_vm3, %v998_v26  ;;  %v947_v26 = vld [vmem:[#allocation4 + $0x68] sm:$0xff] }
 0x3a9   :  { %v973_v2 = vpop.xlane.xlu1 %972 }
 0x3aa   :  { %v1001_v17 = vadd.f32 %v973_v2, %v953_v38  ;;  %v948_v38 = vld [vmem:[#allocation4 + $0x70] sm:$0xff] }
 0x3ac   :  { %1018 = vst.msk [vmem:[#allocation4 + $0x18] sm:$0xff] %vm230_vm3, %v1001_v17  ;;  %v969_v43 = vpop.xlane.xlu0 %968 }
 0x3ad   :  { %v999_v35 = vadd.f32 %v969_v43, %v951_v46  ;;  %v963_v43 = vmul.f32 %v2306_v52, %v947_v26 }
 0x3ae   :  { %v1317_v13 = vld [vmem:[#allocation4 + $0x10] sm:$0xff] }
 0x3af   :  { %1016 = vst.msk [vmem:[#allocation4 + $0x8] sm:$0xff] %vm230_vm3, %v999_v35  ;;  %1767 = vrcp.f32 %v1317_v13  ;;  %v1315_v30 = vld [vmem:[#allocation4] sm:$0xff]  ;;  %v964_v35 = vmul.f32 %v2304_v37, %v948_v38 }
 0x3b0   :  { %1769 = vrcp.f32 %v1315_v30 }
 0x3b1   :  { %v979_v40 = vpop.xlane.xlu0 %978 }
 0x3b2   :  { %v1004_v10 = vadd.f32 %v979_v40, %v956_v23 }
 0x3b3   :  { %v1318_v32 = vld [vmem:[#allocation4 + $0x18] sm:$0xff] }
 0x3b4   :  { %1021 = vst.msk [vmem:[#allocation4 + $0x30] sm:$0xff] %vm230_vm3, %v1004_v10  ;;  %1771 = vrcp.f32 %v1318_v32 }
 0x3b5   :  { %v975_v1 = vpop.xlane.xlu0 %974 }
 0x3b6   :  { %v1002_v57 = vadd.f32 %v975_v1, %v954_v47  ;;  %v1316_v60 = vld [vmem:[#allocation4 + $0x8] sm:$0xff] }
 0x3b7   :  { %1773 = vrcp.f32 %v1316_v60 }
 0x3b8   :  { %1019 = vst.msk [vmem:[#allocation4 + $0x20] sm:$0xff] %vm230_vm3, %v1002_v57 }
 0x3b9   :  { %v1768_v58 = vpop.eup %1767 }
 0x3ba   :  { %1359 = vperm.xlu1 %1686, %v1768_v58   ;;  %v1770_v63 = vpop.eup %1769 }
 0x3bb   :  { %v1321_v0 = vld [vmem:[#allocation4 + $0x30] sm:$0xff] }
 0x3bc   :  { %1775 = vrcp.f32 %v1321_v0 }
 0x3bd   :  { %v981_v5 = vpop.xlane.xlu1 %980 }
 0x3be   :  { %v1772_v4 = vpop.eup %1771  ;;  %v1005_v19 = vadd.f32 %v981_v5, %v957_v9  ;;  %1349 = vperm.xlu1 %1686, %v1770_v63  }
 0x3bf   :  { %1364 = vperm.xlu0 %1685, %v1772_v4   ;;  %v1319_v27 = vld [vmem:[#allocation4 + $0x20] sm:$0xff] }
 0x3c0   :  { %1022 = vst.msk [vmem:[#allocation4 + $0x38] sm:$0xff] %vm230_vm3, %v1005_v19  ;;  %1777 = vrcp.f32 %v1319_v27 }
 0x3c1   :  { %v1774_v39 = vpop.eup %1773  ;;  %v977_v42 = vpop.xlane.xlu1 %976 }
 0x3c2   :  { %v1003_v6 = vadd.f32 %v977_v42, %v955_v33 }
 0x3c3   :  { %1354 = vperm.xlu0 %1685, %v1774_v39  }
 0x3c4   :  { %1020 = vst.msk [vmem:[#allocation4 + $0x28] sm:$0xff] %vm230_vm3, %v1003_v6 }
 0x3c5   :  { %v989_v16 = vpop.xlane.xlu1 %988  ;;  %v987_v50 = vpop.xlane.xlu0 %986 }
 0x3c6   :  { %v1776_v28 = vpop.eup %1775  ;;  %v1009_v49 = vadd.f32 %v989_v16, %v961_v24  ;;  %v1008_v29 = vadd.f32 %v987_v50, %v960_v59 }
 0x3c7   :  { %1379 = vperm.xlu1 %1686, %v1776_v28   ;;  %v1322_v48 = vld [vmem:[#allocation4 + $0x38] sm:$0xff] }
 0x3c8   :  { %1026 = vst.msk [vmem:[#allocation4 + $0x58] sm:$0xff] %vm230_vm3, %v1009_v49  ;;  %1025 = vst.msk [vmem:[#allocation4 + $0x50] sm:$0xff] %vm230_vm3, %v1008_v29  ;;  %1779 = vrcp.f32 %v1322_v48 }
 0x3c9   :  { %v985_v51 = vpop.xlane.xlu1 %984  ;;  %v983_v20 = vpop.xlane.xlu0 %982 }
 0x3ca   :  { %v1778_v15 = vpop.eup %1777  ;;  %v1007_v34 = vadd.f32 %v985_v51, %v959_v56  ;;  %v1006_v21 = vadd.f32 %v983_v20, %v958_v54 }
 0x3cb   :  { %1369 = vperm.xlu1 %1686, %v1778_v15   ;;  %v1320_v7 = vld [vmem:[#allocation4 + $0x28] sm:$0xff] }
 0x3cc   :  { %1024 = vst.msk [vmem:[#allocation4 + $0x48] sm:$0xff] %vm230_vm3, %v1007_v34  ;;  %1023 = vst.msk [vmem:[#allocation4 + $0x40] sm:$0xff] %vm230_vm3, %v1006_v21  ;;  %1781 = vrcp.f32 %v1320_v7 }
 0x3cd   :  { %v997_v25 = vpop.xlane.xlu1 %996  ;;  %v991_v41 = vpop.xlane.xlu0 %990 }
 0x3ce   :  { %v1013_v11 = vadd.f32 %v997_v25, %v965_v14  ;;  %v1010_v2 = vadd.f32 %v991_v41, %v962_v31 }
 0x3cf   :  { %v1326_v17 = vld [vmem:[#allocation4 + $0x58] sm:$0xff]  ;;  %v1325_v46 = vld [vmem:[#allocation4 + $0x50] sm:$0xff] }
 0x3d0   :  { %1030 = vst.msk [vmem:[#allocation4 + $0x78] sm:$0xff] %vm230_vm3, %v1013_v11  ;;  %1027 = vst.msk [vmem:[#allocation4 + $0x60] sm:$0xff] %vm230_vm3, %v1010_v2  ;;  %1783 = vrcp.f32 %v1326_v17 }
 0x3d1   :  { %v993_v3 = vpop.xlane.xlu1 %992  ;;  %v995_v61 = vpop.xlane.xlu0 %994  ;;  %1785 = vrcp.f32 %v1325_v46 }
 0x3d2   :  { %v1780_v36 = vpop.eup %1779  ;;  %v1011_v13 = vadd.f32 %v993_v3, %v963_v43  ;;  %v1012_v23 = vadd.f32 %v995_v61, %v964_v35 }
 0x3d3   :  { %1384 = vperm.xlu0 %1685, %v1780_v36   ;;  %v1324_v30 = vld [vmem:[#allocation4 + $0x48] sm:$0xff]  ;;  %v1323_v40 = vld [vmem:[#allocation4 + $0x40] sm:$0xff] }
 0x3d4   :  { %1028 = vst.msk [vmem:[#allocation4 + $0x68] sm:$0xff] %vm230_vm3, %v1011_v13  ;;  %1029 = vst.msk [vmem:[#allocation4 + $0x70] sm:$0xff] %vm230_vm3, %v1012_v23  ;;  %1787 = vrcp.f32 %v1324_v30 }
 0x3d5   :  { %1789 = vrcp.f32 %v1323_v40  ;;  %v1055_v42 = vpop.permute.xlu1 %1054 }
 0x3d6   :  { %v1782_v18 = vpop.eup %1781  ;;  %v1128_v35 = vmul.f32 0.0, %v1055_v42 }
 0x3d7   :  { %1374 = vperm.xlu0 %1685, %v1782_v18   ;;  %v1327_v52 = vld [vmem:[#allocation4 + $0x60] sm:$0xff]  ;;  %v1330_v1 = vld [vmem:[#allocation4 + $0x78] sm:$0xff] }
 0x3d8   :  { %1791 = vrcp.f32 %v1327_v52 }
 0x3d9   :  { %v1050_v24 = vpop.permute.xlu0 %1049  ;;  %v1060_v16 = vpop.permute.xlu1 %1059 }
 0x3da   :  { %v1784_v37 = vpop.eup %1783  ;;  %v1129_v7 = vmul.f32 0.0, %v1060_v16  ;;  %v1127_v25 = vmul.f32 0.0, %v1050_v24 }
 0x3db   :  { %v1786_v10 = vpop.eup %1785  ;;  %1404 = vperm.xlu0 %1685, %v1784_v37   ;;  %v1328_v32 = vld [vmem:[#allocation4 + $0x68] sm:$0xff]  ;;  %v1329_v47 = vld [vmem:[#allocation4 + $0x70] sm:$0xff] }
 0x3dc   :  { %1399 = vperm.xlu1 %1686, %v1786_v10   ;;  %1793 = vrcp.f32 %v1328_v32 }
 0x3dd   :  { %1795 = vrcp.f32 %v1329_v47  ;;  %v1065_v8 = vpop.permute.xlu0 %1064  ;;  %v1070_v28 = vpop.permute.xlu1 %1069 }
 0x3de   :  { %v1788_v57 = vpop.eup %1787  ;;  %1797 = vrcp.f32 %v1330_v1  ;;  %v1130_v38 = vmul.f32 0.0, %v1065_v8  ;;  %v1131_v18 = vmul.f32 0.0, %v1070_v28 }
 0x3df   :  { %v1790_v60 = vpop.eup %1789  ;;  %1394 = vperm.xlu0 %1685, %v1788_v57  }
 0x3e0   :  { %1389 = vperm.xlu1 %1686, %v1790_v60  }
 0x3e1   :  { %v1075_v48 = vpop.permute.xlu0 %1074  ;;  %v1080_v56 = vpop.permute.xlu1 %1079 }
 0x3e2   :  { %v1792_v58 = vpop.eup %1791  ;;  %v1133_v13 = vmul.f32 0.0, %v1080_v56  ;;  %v1132_v60 = vmul.f32 0.0, %v1075_v48 }
 0x3e4   :  { %1409 = vperm.xlu1 %1686, %v1792_v58  }
 0x3e5   :  { %v1085_v54 = vpop.permute.xlu0 %1084  ;;  %v1090_v51 = vpop.permute.xlu1 %1089 }
 0x3e6   :  { %v1794_v62 = vpop.eup %1793  ;;  %v1134_v47 = vmul.f32 0.0, %v1085_v54  ;;  %v1135_v42 = vmul.f32 0.0, %v1090_v51 }
 0x3e7   :  { %v1796_v0 = vpop.eup %1795  ;;  %1414 = vperm.xlu0 %1685, %v1794_v62  }
 0x3e8   :  { %1419 = vperm.xlu1 %1686, %v1796_v0   ;;  %v1798_v9 = vpop.eup %1797 }
 0x3e9   :  { %v1095_v20 = vpop.permute.xlu0 %1094  ;;  %v1100_v44 = vpop.permute.xlu1 %1099 }
 0x3eb   :  { %1424 = vperm.xlu0 %1685, %v1798_v9  }
 0x3ed   :  { %v1105_v55 = vpop.permute.xlu0 %1104  ;;  %v1110_v15 = vpop.permute.xlu1 %1109 }
 0x3ee   :  { %v1138_v9 = vmul.f32 0.0, %v1105_v55  ;;  %v1139_v48 = vmul.f32 0.0, %v1110_v15 }
 0x3f1   :  { %v2357_v34 = vpop.permute.xlu0 %1114  ;;  %v2359_v21 = vpop.permute.xlu1 %1119 }
 0x3f2   :  { %v1141_v51 = vmul.f32 0.0, %v2359_v21 }
 0x3f5   :  { %v1667_v63 = vpop.f32.mrb[32].mxu0  ;;  %v2361_v41 = vpop.permute.xlu0 %1124 }
 0x3f6   :  { %v1185_v5 = vpop.f32.mrb[33].mxu0  ;;  %v1250_v14 = vadd.f32 %v1667_v63, %v1129_v7 }
 0x3f7   :  { %v1668_v12 = vpop.f32.mrb[34].mxu0  ;;  %v1248_v11 = vadd.f32 %v1185_v5, %v1127_v25  ;;  %v1137_v5 = vmul.f32 0.0, %v1100_v44 }
 0x3f8   :  { %v1188_v4 = vpop.f32.mrb[35].mxu0  ;;  %v1251_v2 = vadd.f32 %v1668_v12, %v1130_v38 }
 0x3f9   :  { %v1249_v61 = vadd.f32 %v1188_v4, %v1128_v35 }
 0x405   :  { %v1671_v19 = vpop.f32.mrb[36].mxu0 }
 0x406   :  { %v1201_v27 = vpop.f32.mrb[37].mxu0  ;;  %v1254_v30 = vadd.f32 %v1671_v19, %v1133_v13 }
 0x407   :  { %v1672_v33 = vpop.f32.mrb[38].mxu0  ;;  %v1252_v37 = vadd.f32 %v1201_v27, %v1131_v18  ;;  %v1136_v27 = vmul.f32 0.0, %v1095_v20 }
 0x408   :  { %v1204_v39 = vpop.f32.mrb[39].mxu0  ;;  %v1255_v1 = vadd.f32 %v1672_v33, %v1134_v47 }
 0x409   :  { %v1253_v62 = vadd.f32 %v1204_v39, %v1132_v60 }
 0x40d   :  { %v2341_v45 = vpop.f32.mrb[40].mxu0 }
 0x40e   :  { %v2343_v53 = vpop.f32.mrb[41].mxu0  ;;  %v1258_v4 = vadd.f32 %v2341_v45, %v1137_v5 }
 0x40f   :  { %v2345_v6 = vpop.f32.mrb[42].mxu0 }
 0x410   :  { %v2347_v59 = vpop.f32.mrb[43].mxu0  ;;  %v1259_v12 = vadd.f32 %v2345_v6, %v1138_v9  ;;  %v1256_v6 = vadd.f32 %v2343_v53, %v1135_v42  ;;  %v1140_v53 = vmul.f32 0.0, %v2357_v34 }
 0x411   :  { %v1257_v16 = vadd.f32 %v2347_v59, %v1136_v27 }
 0x415   :  { %v2349_v50 = vpop.f32.mrb[44].mxu0 }
 0x416   :  { %v2351_v22 = vpop.f32.mrb[45].mxu0  ;;  %v1262_v55 = vadd.f32 %v2349_v50, %v1141_v51 }
 0x417   :  { %v2353_v49 = vpop.f32.mrb[46].mxu0  ;;  %v1260_v59 = vadd.f32 %v2351_v22, %v1139_v48  ;;  %v1142_v22 = vmul.f32 0.0, %v2361_v41 }
 0x418   :  { %v2355_v29 = vpop.f32.mrb[47].mxu0 }
 0x419   :  { %v1261_v44 = vadd.f32 %v2355_v29, %v1140_v53  ;;  %v1263_v34 = vadd.f32 %v2353_v49, %v1142_v22 }
 0x439   :  { %v1360_v31 = vpop.permute.xlu1 %1359 }
 0x43a   :  { %v1429_v26 = vmul.f32 %v1360_v31, %v1250_v14 }
 0x43c   :  { %1445 = vst [vmem:[%s2428_s6 + $0x10] sm:$0xff] %v1429_v26 }
 0x43d   :  { %v1350_v17 = vpop.permute.xlu1 %1349 }
 0x43e   :  { %v1427_v46 = vmul.f32 %v1350_v17, %v1248_v11  ;;  %v1365_v43 = vpop.permute.xlu0 %1364 }
 0x43f   :  { %v1430_v3 = vmul.f32 %v1365_v43, %v1251_v2 }
 0x440   :  { %1443 = vst [vmem:[%s2428_s6] sm:$0xff] %v1427_v46 }
 0x441   :  { %1446 = vst [vmem:[%s2428_s6 + $0x18] sm:$0xff] %v1430_v3 }
 0x442   :  { %v1355_v36 = vpop.permute.xlu0 %1354 }
 0x443   :  { %v1428_v23 = vmul.f32 %v1355_v36, %v1249_v61 }
 0x445   :  { %1444 = vst [vmem:[%s2428_s6 + $0x8] sm:$0xff] %v1428_v23 }
 0x446   :  { %v1380_v40 = vpop.permute.xlu1 %1379 }
 0x447   :  { %v1433_v52 = vmul.f32 %v1380_v40, %v1254_v30 }
 0x449   :  { %1449 = vst [vmem:[%s2428_s6 + $0x30] sm:$0xff] %v1433_v52 }
 0x44a   :  { %v1370_v10 = vpop.permute.xlu1 %1369 }
 0x44b   :  { %v1431_v32 = vmul.f32 %v1370_v10, %v1252_v37 }
 0x44d   :  { %1447 = vst [vmem:[%s2428_s6 + $0x20] sm:$0xff] %v1431_v32 }
 0x452   :  { %v1385_v57 = vpop.permute.xlu0 %1384 }
 0x453   :  { %v1434_v58 = vmul.f32 %v1385_v57, %v1255_v1 }
 0x455   :  { %1450 = vst [vmem:[%s2428_s6 + $0x38] sm:$0xff] %v1434_v58 }
 0x456   :  { %v1375_v0 = vpop.permute.xlu0 %1374 }
 0x457   :  { %v1432_v63 = vmul.f32 %v1375_v0, %v1253_v62 }
 0x459   :  { %1448 = vst [vmem:[%s2428_s6 + $0x28] sm:$0xff] %v1432_v63 }
 0x45a   :  { %v1405_v19 = vpop.permute.xlu0 %1404 }
 0x45b   :  { %v1400_v33 = vpop.permute.xlu1 %1399  ;;  %v1438_v39 = vmul.f32 %v1405_v19, %v1259_v12 }
 0x45c   :  { %v1437_v24 = vmul.f32 %v1400_v33, %v1258_v4 }
 0x45d   :  { %1454 = vst [vmem:[%s2428_s6 + $0x58] sm:$0xff] %v1438_v39 }
 0x45e   :  { %1453 = vst [vmem:[%s2428_s6 + $0x50] sm:$0xff] %v1437_v24  ;;  %v1395_v8 = vpop.permute.xlu0 %1394 }
 0x45f   :  { %v1390_v45 = vpop.permute.xlu1 %1389  ;;  %v1436_v28 = vmul.f32 %v1395_v8, %v1257_v16 }
 0x460   :  { %v1435_v56 = vmul.f32 %v1390_v45, %v1256_v6 }
 0x461   :  { %1452 = vst [vmem:[%s2428_s6 + $0x48] sm:$0xff] %v1436_v28 }
 0x462   :  { %1451 = vst [vmem:[%s2428_s6 + $0x40] sm:$0xff] %v1435_v56 }
 0x463   :  { %v1410_v54 = vpop.permute.xlu1 %1409 }
 0x464   :  { %v1439_v20 = vmul.f32 %v1410_v54, %v1260_v59 }
 0x466   :  { %1455 = vst [vmem:[%s2428_s6 + $0x60] sm:$0xff] %v1439_v20  ;;  %v1415_v15 = vpop.permute.xlu0 %1414 }
 0x467   :  { %v1420_v7 = vpop.permute.xlu1 %1419  ;;  %v1440_v14 = vmul.f32 %v1415_v15, %v1261_v44 }
 0x468   :  { %v1441_v31 = vmul.f32 %v1420_v7, %v1262_v55 }
 0x469   :  { %1456 = vst [vmem:[%s2428_s6 + $0x68] sm:$0xff] %v1440_v14 }
 0x46a   :  { %1457 = vst [vmem:[%s2428_s6 + $0x70] sm:$0xff] %v1441_v31  ;;  %v1425_v50 = vpop.permute.xlu0 %1424 }
 0x46b   :  { %v1442_v29 = vmul.f32 %v1425_v50, %v1263_v34 }
 0x46d   :  { %1458 = vst [vmem:[%s2428_s6 + $0x78] sm:$0xff] %v1442_v29 }

</bundles_post_ra>
